<compile_context>
chip_gen: v6e
topology: v6e:2x2x1
jax: 0.10.0
libtpu: 0.0.40
codegen_flags: <defaults>
</compile_context>

<pallas_src>
import functools

import jax
import jax.numpy as jnp
from jax.experimental import pallas as pl
from jax.experimental.pallas import tpu as pltpu


def _round_up(x, m):
    return (x + m - 1) // m * m


def _cdiv(a, b):
    return (a + b - 1) // b


def _vmem_capacity_bytes():
    try:
        return int(pltpu.get_tpu_info().vmem_capacity_bytes)
    except Exception:
        return 64 << 20  # conservative fallback (v7x per-core VMEM)


def _fused_buckswin_kernel(x_ref, w_ref, b_ref, o_ref, *, compute_dtype):
    """o_tile = cast(x_tile) @ W_tile + b_tile, f32 accumulation on the MXU."""
    x = x_ref[...].astype(compute_dtype)          # in-kernel cast (no wrapper copy of x)
    acc = jnp.dot(x, w_ref[...], preferred_element_type=jnp.float32)
    o_ref[...] = (acc + b_ref[...]).astype(o_ref.dtype)


def fuse_buckswin_params(params):
    """One-time algebraic fold (exact for the documented linear 'attention').

    Hoisted out of the per-call path: 2*C^3 FLOPs paid once, not per step.
    """
    C = params["wproj"].shape[0]
    wqkv = params["wqkv"].astype(jnp.float32)     # [C, 3C]  (x @ W layout)
    bqkv = params["bqkv"].astype(jnp.float32)     # [3C]
    wproj = params["wproj"].astype(jnp.float32)   # [C, C]
    bproj = params["bproj"].astype(jnp.float32)   # [C]
    w1 = wqkv[:, 0:C] + wqkv[:, 2 * C:3 * C]      # Wq + Wv
    b1 = bqkv[0:C] + bqkv[2 * C:3 * C]            # bq + bv
    return {"w_fused": w1 @ wproj,                # [C, C], folded in f32
            "b_fused": b1 @ wproj + bproj}        # [C]


def bucket_swin_attention_module(x, scope_buckets, fused_params, *, num_heads,
                                 buck_size, compute_dtype=jnp.bfloat16,
                                 out_dtype=None):
    """x: [B, L, C].  scope_buckets: [B, L] bucket ids (unused by documented fwd).

    fused_params: output of fuse_buckswin_params(params) (precompute once).
    compute_dtype: MXU operand dtype (bf16 recommended on v6e/v7x; f32 exact).
    out_dtype: output dtype (defaults to x.dtype; bf16 halves writeback traffic).
    """
    assert x.ndim == 3, "expect [B, L, C]"
    B, L, C = x.shape
    assert C % num_heads == 0
    # TODO(synk): scope_buckets / buck_size / head split do not affect the
    # documented dummy buck_swin forward (O = Q + V), so they are unused here.
    del scope_buckets, buck_size, num_heads

    out_dtype = x.dtype if out_dtype is None else out_dtype
    w_fused = fused_params["w_fused"].astype(compute_dtype)   # small C*C cast
    b_fused = fused_params["b_fused"].astype(jnp.float32)

    rows = B * L
    Cp = _round_up(C, 128)                  # lane-dense last dim
    x2d = x.reshape(rows, C)                # contiguous reshape, no copy, no cast
    b2d = b_fused.reshape(1, C)
    if Cp != C:
        # K-dim padding MUST be explicit zeros (garbage along K would corrupt
        # valid output columns). Row dim is never padded (Pallas masks it).
        x2d = jnp.pad(x2d, ((0, 0), (0, Cp - C)))
        w_fused = jnp.pad(w_fused, ((0, Cp - C), (0, Cp - C)))
        b2d = jnp.pad(b2d, ((0, 0), (0, Cp - C)))

    x_isz = jnp.dtype(x2d.dtype).itemsize
    w_isz = jnp.dtype(compute_dtype).itemsize
    o_isz = jnp.dtype(out_dtype).itemsize

    # Generation-aware VMEM budget: ~85% of capacity, >=16 MiB headroom.
    cap = _vmem_capacity_bytes()
    budget = max(min(cap - (16 << 20), int(cap * 0.85)), 24 << 20)

    rows128 = _round_up(rows, 128)
    # Prefer >=2 row tiles so v7x's two TensorCores get balanced shards.
    rt_cap = rows128 if rows128 <= 128 else max(128, _round_up(_cdiv(rows128, 2), 128))

    def vmem_need(rt, ct):
        # double-buffered x / W / out tiles + bias + compiler margin
        return 2 * (rt * Cp * x_isz + Cp * ct * w_isz + rt * ct * o_isz
                    + 8 * ct * 4) + (2 << 20)

    # Prefer ct == Cp (resident weight: fetched once, never re-streamed).
    ct_candidates = [Cp] + [c for c in (1024, 512, 256, 128)
                            if c < Cp and Cp % c == 0]
    rt_candidates = (2048, 1024, 512, 256, 128)
    rt, ct = 128, ct_candidates[-1]
    found = False
    for ct_c in ct_candidates:
        for rt_c in rt_candidates:
            if rt_c > rt_cap:
                continue
            if vmem_need(rt_c, ct_c) <= budget:
                rt, ct = rt_c, ct_c
                found = True
                break
        if found:
            break
    # TODO(synk): for very large Cp (>= ~4K) on v7x a K-tiled accumulator
    # variant (extra 'arbitrary' grid axis + f32 scratch) would be needed;
    # not required at these channel counts.

    n_row = _cdiv(rows, rt)
    n_col = Cp // ct
    grid = (n_row, n_col)

    # Weight is re-streamed per row tile only when column tiling is in use.
    w_bytes = Cp * Cp * w_isz * (n_row if n_col > 1 else 1)
    cost = pl.CostEstimate(
        flops=2 * rows * Cp * Cp,
        transcendentals=0,
        bytes_accessed=rows * Cp * x_isz + rows * Cp * o_isz + w_bytes + Cp * 4,
    )

    vmem_limit = int(min(max(vmem_need(rt, ct), 32 << 20), budget))

    out2d = pl.pallas_call(
        functools.partial(_fused_buckswin_kernel, compute_dtype=compute_dtype),
        out_shape=jax.ShapeDtypeStruct((rows, Cp), out_dtype),
        grid_spec=pltpu.PrefetchScalarGridSpec(
            num_scalar_prefetch=0,
            grid=grid,
            in_specs=[
                pl.BlockSpec((rt, Cp), lambda i, j: (i, 0)),   # x rows (full K)
                pl.BlockSpec((Cp, ct), lambda i, j: (0, j)),   # fused weight (resident when n_col==1)
                pl.BlockSpec((1, ct), lambda i, j: (0, j)),    # fused bias
            ],
            out_specs=pl.BlockSpec((rt, ct), lambda i, j: (i, j)),
        ),
        compiler_params=pltpu.CompilerParams(
            dimension_semantics=("parallel", "parallel"),
            vmem_limit_bytes=vmem_limit,
        ),
        cost_estimate=cost,
    )(x2d, w_fused, b2d)

    if Cp != C:
        out2d = out2d[:, :C]
    return out2d.reshape(B, L, C)


def init_params(key, channels):
    """Deterministic synthetic parameters matching the nn.Module shapes."""
    kq, kb, kp, kpb = jax.random.split(key, 4)
    scale = 1.0 / jnp.sqrt(channels)
    return {
        # nn.Linear(channels, 3*channels) weight is [3C, C] in torch;
        # stored here transposed as [C, 3C] so the kernel computes x @ W.
        "wqkv": jax.random.normal(kq, (channels, 3 * channels), jnp.float32) * scale,
        "bqkv": jax.random.normal(kb, (3 * channels,), jnp.float32) * scale,
        "wproj": jax.random.normal(kp, (channels, channels), jnp.float32) * scale,
        "bproj": jax.random.normal(kpb, (channels,), jnp.float32) * scale,
    }


def _reference(x, params):
    """Plain-JAX reference of the module's documented forward, for validation."""
    B, L, C = x.shape
    xf = x.reshape(B * L, C).astype(jnp.float32)
    qkv = xf @ params["wqkv"] + params["bqkv"]
    q, _, v = jnp.split(qkv, 3, axis=-1)
    attn = q + v                              # documented dummy buck_swin fwd
    out = attn @ params["wproj"] + params["bproj"]
    return out.reshape(B, L, C)


if __name__ == "__main__":
    B, L, C = 2, 512, 128
    num_heads, buck_size = 4, 16

    key = jax.random.PRNGKey(0)
    kx, kparams = jax.random.split(key)
    x = jax.random.normal(kx, (B, L, C), jnp.float32)
    # scope_buckets: bucket index per token (unused by the documented dummy fwd)
    scope_buckets = jnp.tile(
        jnp.arange(L // buck_size, dtype=jnp.int32).repeat(buck_size)[None, :],
        (B, 1))
    params = init_params(kparams, C)

    # One-time algebraic fold, hoisted out of the per-call path.
    fused = fuse_buckswin_params(params)
    fused = jax.tree_util.tree_map(jax.block_until_ready, fused)

    ref = _reference(x, params)

    # f32 operands: tight check of the fused kernel against the module math.
    fwd_f32 = jax.jit(functools.partial(
        bucket_swin_attention_module, num_heads=num_heads,
        buck_size=buck_size, compute_dtype=jnp.float32))
    out_f32 = jax.block_until_ready(fwd_f32(x, scope_buckets, fused))
    assert out_f32.shape == (B, L, C)
    assert jnp.allclose(out_f32, ref, atol=2e-3, rtol=2e-3), "f32 mismatch vs reference"

    # bf16 operands + f32 accumulation: the recommended v6e/v7x MXU fast path.
    fwd_bf16 = jax.jit(functools.partial(
        bucket_swin_attention_module, num_heads=num_heads,
        buck_size=buck_size, compute_dtype=jnp.bfloat16))
    out_bf16 = jax.block_until_ready(fwd_bf16(x, scope_buckets, fused))
    assert out_bf16.shape == (B, L, C)
    assert jnp.allclose(out_bf16.astype(jnp.float32), ref, atol=5e-2, rtol=5e-2), \
        "bf16 mismatch vs reference"

    print("KERNEL_OK")
</pallas_src>

<mosaic_0001>
module attributes {stable_mosaic.version = 11 : i64} {
  func.func @_fused_buckswin_kernel(%arg0: i32, %arg1: i32, %arg2: memref<512x128xf32, #tpu.memory_space<vmem>>, %arg3: memref<128x128xf32, #tpu.memory_space<vmem>>, %arg4: memref<1x128xf32, #tpu.memory_space<vmem>>, %arg5: memref<512x128xf32, #tpu.memory_space<vmem>>) attributes {dimension_semantics = [#tpu.dimension_semantics<parallel>, #tpu.dimension_semantics<parallel>], iteration_bounds = array<i64: 2, 1>, scalar_prefetch = 0 : i64, scratch_operands = 0 : i64, tpu.core_type = #tpu.core_type<tc>, window_params = [{transform_indices = @transform_0, window_bounds = array<i64: 512, 128>}, {transform_indices = @transform_1, window_bounds = array<i64: 128, 128>}, {transform_indices = @transform_2, window_bounds = array<i64: 1, 128>}, {transform_indices = @transform_3, window_bounds = array<i64: 512, 128>}]} {
    %c0 = arith.constant 0 : index
    %c0_0 = arith.constant 0 : index
    %0 = vector.load %arg2[%c0, %c0_0] : memref<512x128xf32, #tpu.memory_space<vmem>>, vector<512x128xf32>
    %c0_1 = arith.constant 0 : index
    %c0_2 = arith.constant 0 : index
    %1 = vector.load %arg3[%c0_1, %c0_2] : memref<128x128xf32, #tpu.memory_space<vmem>>, vector<128x128xf32>
    %cst = arith.constant dense<0.000000e+00> : vector<512x128xf32>
    %2 = tpu.matmul %0, %1, %cst {dimension_numbers = #tpu.dot_dimension_numbers<[1], [0], [0], [1], [0, 0, 1, 1], [], []>} : vector<512x128xf32>, vector<128x128xf32>, vector<512x128xf32> -> vector<512x128xf32>
    %c0_3 = arith.constant 0 : index
    %c0_4 = arith.constant 0 : index
    %3 = vector.load %arg4[%c0_3, %c0_4] : memref<1x128xf32, #tpu.memory_space<vmem>>, vector<1x128xf32>
    %4 = vector.broadcast %3 : vector<1x128xf32> to vector<512x128xf32>
    %5 = arith.addf %2, %4 : vector<512x128xf32>
    %c0_5 = arith.constant 0 : index
    %c0_6 = arith.constant 0 : index
    %6 = vector.load %arg5[%c0_5, %c0_6] : memref<512x128xf32, #tpu.memory_space<vmem>>, vector<512x128xf32>
    tpu.vector_store %arg5[%c0_5, %c0_6], %5 {strides = array<i32>} : memref<512x128xf32, #tpu.memory_space<vmem>>, vector<512x128xf32>,
    return
  }
  func.func @transform_0(%arg0: i32, %arg1: i32) -> (i32, i32) {
    %c0_i32 = arith.constant 0 : i32
    %c0_i32_0 = arith.constant 0 : i32
    return %arg0, %c0_i32 : i32, i32
  }
  func.func @transform_1(%arg0: i32, %arg1: i32) -> (i32, i32) {
    %c0_i32 = arith.constant 0 : i32
    %c0_i32_0 = arith.constant 0 : i32
    return %c0_i32, %arg1 : i32, i32
  }
  func.func @transform_2(%arg0: i32, %arg1: i32) -> (i32, i32) {
    %c0_i32 = arith.constant 0 : i32
    %c0_i32_0 = arith.constant 0 : i32
    return %c0_i32, %arg1 : i32, i32
  }
  func.func @transform_3(%arg0: i32, %arg1: i32) -> (i32, i32) {
    %c0_i32 = arith.constant 0 : i32
    return %arg0, %arg1 : i32, i32
  }
}

</mosaic_0001>

<bundles_post_ra>
// kernel: bucket_swin_attention_module.1
= control target key start
LH: loop header
LB: loop body
LE: loop exit
PB: predicated region body
PF: predicated region fallthrough
CT: control target
= control target key end

     0   :  { %8 = vsyncpa [#allocation3], 0  ;;  %s1797_s0 = inlined_call_operand.hbm [shape: f32[1024,128], index: 0, kind: input, shape index: {}]   ;;  %s1798_s1 = inlined_call_operand.hbm [shape: f32[128,128], index: 1, kind: input, shape index: {}]   ;;  %s1799_s2 = inlined_call_operand.vmem [shape: f32[1,128], index: 2, kind: input, shape index: {}]   ;;  %s1800_s3 = inlined_call_operand.hbm [shape: f32[1024,128], index: 3, kind: output, shape index: {}]  }
   0x1   :  { %10 = vsyncpa [#allocation3 + $0x1], 0 }
   0x2   :  { %11 = vsyncpa [#allocation6], 0 }
   0x3   :  { %12 = vsyncpa [#allocation4], 0 }
   0x4   :  { %14 = vsyncpa [#allocation4 + $0x1], 0  ;;  %s1404_s12 = smov 0   ;;  %s1406_s13 = smov 0  }
   0x5   :  { %s1408_s14 = smov 0   ;;  %s1410_s15 = smov 0  }
   0x6   :  { %s1412_s16 = smov 0   ;;  %s1414_s17 = smov 0  }
   0x7 LB: > { %s899_s18 = sadd.s32 4294967295, %s1375_s17   ;;  %s900_s19 = sadd.s32 4294967294, %s1375_s17   ;;  %s1375_s17 = sphi %s1414_s17, %s20_s17   ;;  %s1371_s16 = sphi %s1412_s16, %s1822_s16   ;;  %s1367_s15 = sphi %s1410_s15, %s1821_s15   ;;  %s1363_s14 = sphi %s1408_s14, %s1820_s14   ;;  %s1359_s13 = sphi %s1406_s13, %s1819_s13   ;;  %s1355_s12 = sphi %s1404_s12, %s1818_s12  }
   0x8   : > { %p52_p0 = scmp.ne.s32.totalorder %s1359_s13, %s1355_s12  ;;  %p1438_p1 = scmp.eq.s32.totalorder %s899_s18, 0 }
   0x9   : > { %p1442_p2 = scmp.eq.s32.totalorder %s899_s18, 1  ;;  %p136_p3 = scmp.eq.s32.totalorder %s900_s19, 1 }
   0xa   : > { %p1448_p4 = por %p1438_p1, %p52_p0  ;;  %p901_p5 = scmp.ge.s32.totalorder %s1375_s17, 1 }
   0xb   : > { %p1453_p6 = por %p136_p3, %p52_p0  ;;  %p143_p7 = scmp.lt.s32.totalorder %s1375_s17, 3 }
   0xc   : > { %s1806_s22 = scalar_select %p1448_p4, 1, 0 }
   0xd   : > { %s1807_s23 = scalar_select %p1453_p6, 1, 0 }
   0xe   : > { %p1458_p8 = pnand %p901_p5, %p143_p7  ;;  %s1377_s25 = smov [#allocation5]  }
   0xf   : > { %s157_s26 = sshll.u32 %s1377_s25, 4  ;;  %s32_s28 = sadd.s32 1, %s1371_s16  ;;  %s158_s26 = int_to_ptr.vmem [resolvable:$true] %s157_s26 }
  0x10   : > { %p1168_p9 = pneg %p1458_p8  ;;  %s1248_s29 = scalar_lea.vmem %s158_s26, 2048 }
  0x11   : > { %p1249_p13 = scmp.ne.s32.totalorder %s158_s26, %s1248_s29  ;;  %p1256_p5 = scmp.lt.s32.totalorder %s158_s26, %s158_s26 }
  0x12   : > { %p1467_p11 = pnand %p1168_p9, %p1438_p1  ;;  %p1257_p7 = scmp.lt.s32.totalorder %s1248_s29, %s1248_s29 }
  0x14   : > { %p1239_p12 = pneg %p1467_p11  ;;  %p1258_p6 = por %p1257_p7, %p1256_p5 }
  0x16   : > { %p1251_p0 = pnand %p1249_p13, %p1239_p12 }
  0x18   : > { %p1252_p3 = pneg %p1251_p0 }
  0x1a   : > { %p1259_p4 = pnand %p1258_p6, %p1252_p3 }
  0x1c   : > { %1262 = shalt.err (!%p1259_p4)
}
  0x1d   : > { %s1802_s30 = smov 128   ;;  %s1803_s4 = smov 8  }
  0x1e   : > { %1171 = dma.hbm_to_vmem [thread:$0]  (!%p1467_p11), %s1798_s1, 2048, %s158_s26, [#allocation6], %s1802_s30, %s1802_s30, %s1803_s4  }
  0x1f   : > { %p34_p4 = scmp.ge.s32.totalorder %s32_s28, 2  ;;  %s39_s7 = sadd.s32 1, %s1363_s14 }
  0x20   : > { %p46_p6 = scmp.ne.s32.totalorder %s1363_s14, %s1359_s13  ;;  %p47_p9 = scmp.eq.s32.totalorder %s1375_s17, 0 }
  0x21   : > { %s1824_s28 = smov (%p34_p4, %s32_s28), 0  ;;  %p1181_p0 = scmp.lt.s32.totalorder %s1375_s17, 2 }
  0x22   : > { %p1488_p12 = por %p47_p9, %p46_p6  ;;  %p1494_p13 = por %p1442_p2, %p46_p6 }
  0x23   : > { %s36_s10 = ssub.s32 %s1371_s16, %s1824_s28  ;;  %s177_s11 = sand.u32 1, %s1363_s14  }
  0x24   : > { %p37_p11 = scmp.eq.s32.totalorder %s36_s10, 0  ;;  %s905_s18 = sshll.u32 %s177_s11, 9 }
  0x25   : > { %s918_s25 = sshll.u32 %s1371_s16, 13  ;;  %s181_s5 = scalar_lea.vmem [#allocation2], %s905_s18 }
  0x26   : > { %s1503_s19 = scalar_select %p37_p11, %s1363_s14, %s39_s7  }
  0x27   : > { %s187_s29 = scalar_lea.hbm %s1797_s0, %s918_s25  ;;  %s188_s6 = sshll.u32 %s181_s5, 4  ;;  %s189_s6 = int_to_ptr.vmem [resolvable:$true] %s188_s6 }
  0x28   : > { %p1511_p2 = pnand %p1181_p0, %p1488_p12  ;;  %s178_s30 = scalar_lea.sflag [#allocation3], %s177_s11 }
  0x29   : > { %s1276_s10 = scalar_lea.vmem %s189_s6, 8192  ;;  %s1380_s7 = smov [#allocation2]  }
  0x2a   : > { %p1265_p3 = pneg %p1511_p2  ;;  %p1277_p5 = scmp.ne.s32.totalorder %s189_s6, %s1276_s10 }
  0x2b   : > { %s1281_s4 = sshll.u32 %s1380_s7, 4  ;;  %s1282_s4 = int_to_ptr.vmem [resolvable:$false] %s1281_s4 }
  0x2c   : > { %p1279_p7 = pnand %p1277_p5, %p1265_p3  ;;  %s1283_s25 = scalar_lea.vmem %s1282_s4, 16384 }
  0x2d   : > { %p1284_p6 = scmp.lt.s32.totalorder %s189_s6, %s1282_s4  ;;  %p1285_p9 = scmp.lt.s32.totalorder %s1283_s25, %s1276_s10 }
  0x2e   : > { %p1280_p4 = pneg %p1279_p7 }
  0x2f   : > { %p1286_p11 = por %p1285_p9, %p1284_p6 }
  0x31   : > { %p1287_p10 = pnand %p1286_p11, %p1280_p4 }
  0x33   : > { %1290 = shalt.err (!%p1287_p10)
}
  0x34   : > { %s1813_s8 = smov 8   ;;  %s1814_s18 = smov 128  }
  0x35   : > { %1175 = dma.hbm_to_vmem [thread:$0]  (!%p1511_p2), %s187_s29, 8192, %s189_s6, %s178_s30, %s1814_s18, %s1814_s18, %s1813_s8  }
  0x36   : > { %200 = sbr.rel (%p1458_p8) target bundleno = 367 (0x16f), region = 32  ;;  %s1525_s11 = sand.u32 (!%p1458_p8), 1, %s1359_s13  }
  0x37   : > { %s909_s4 = sshll.u32 (!%p1458_p8), %s1525_s11, 9  ;;  %s203_s26 = scalar_lea.sflag (!%p1458_p8), [#allocation3], %s1525_s11 }
  0x38   : > { %s1531_s27 = scalar_lea.vmem (!%p1458_p8), [#allocation2], %s909_s4  ;;  %p1815_p10 = scmp.ne.s32.totalorder (!%p1458_p8), %s1806_s22, 0 }
  0x3b   : > { %1342 = dma.done.wait (%p1815_p10), %s203_s26, 8192  }
  0x3c   : > { %1344 = vsyncadd (%p1815_p10), %s203_s26, 4294959104 }
  0x3d   : > { %1346 = dma.done.wait (%p1438_p1), [#allocation6], 2048  }
  0x3e   : > { %1348 = vsyncadd (%p1438_p1), [#allocation6], 4294965248  ;;  %v320_v0 = vld [vmem:[#allocation5 + $0x78] sm:$0xff]  ;;  %v319_v1 = vld [vmem:[#allocation5 + $0x70] sm:$0xff]  ;;  %s1614_s24 = scalar_lea.vmem [#allocation7], %s909_s4  ;;  %s919_s30 = sshll.u32 %s1367_s15, 13 }
  0x3f   : > { %1000 = vmatprep.subr.mxu0 %v320_v0  ;;  %1128 = vmatprep.subr.mxu1 %v320_v0  ;;  %v318_v2 = vld [vmem:[#allocation5 + $0x68] sm:$0xff]  ;;  %v317_v3 = vld [vmem:[#allocation5 + $0x60] sm:$0xff]  ;;  %v316_v4 = vld [vmem:[#allocation5 + $0x58] sm:$0xff]  ;;  %s792_s29 = sshll.u32 %s1614_s24, 4  ;;  %s1741_s21 = scalar_lea.hbm %s1800_s3, %s919_s30  ;;  %s1743_s29 = int_to_ptr.vmem [resolvable:$true] %s792_s29 }
  0x40   : > { %1001 = vmatpush3.msra.mxu0 %v320_v0  ;;  %1144 = vmatpush3.msra.mxu1 %v320_v0  ;;  %v315_v5 = vld [vmem:[#allocation5 + $0x50] sm:$0xff]  ;;  %v314_v6 = vld [vmem:[#allocation5 + $0x48] sm:$0xff]  ;;  %v313_v7 = vld [vmem:[#allocation5 + $0x40] sm:$0xff]  ;;  %s778_s15 = scalar_lea.sflag [#allocation4], %s1525_s11  ;;  %s1291_s10 = scalar_lea.vmem %s1743_s29, 8192 }
  0x41   : > { %1002 = vmatprep.subr.mxu0 %v319_v1  ;;  %1129 = vmatprep.subr.mxu1 %v319_v1  ;;  %v312_v8 = vld [vmem:[#allocation5 + $0x38] sm:$0xff]  ;;  %v311_v9 = vld [vmem:[#allocation5 + $0x30] sm:$0xff]  ;;  %v310_v10 = vld [vmem:[#allocation5 + $0x28] sm:$0xff]  ;;  %p1292_p1 = scmp.ne.s32.totalorder %s1743_s29, %s1291_s10  ;;  %s1381_s7 = smov [#allocation7]  }
  0x42   : > { %1003 = vmatpush3.msra.mxu0 %v319_v1  ;;  %1145 = vmatpush3.msra.mxu1 %v319_v1  ;;  %v309_v11 = vld [vmem:[#allocation5 + $0x20] sm:$0xff]  ;;  %v308_v12 = vld [vmem:[#allocation5 + $0x18] sm:$0xff]  ;;  %v307_v13 = vld [vmem:[#allocation5 + $0x10] sm:$0xff]  ;;  %s1295_s25 = sshll.u32 %s1381_s7, 4  ;;  %s1296_s25 = int_to_ptr.vmem [resolvable:$false] %s1295_s25 }
  0x43   : > { %1004 = vmatprep.subr.mxu0 %v318_v2  ;;  %1130 = vmatprep.subr.mxu1 %v318_v2  ;;  %v306_v14 = vld [vmem:[#allocation5 + $0x8] sm:$0xff]  ;;  %v305_v15 = vld [vmem:[#allocation5] sm:$0xff]  ;;  %v243_v20 = vld [vmem:[%s1531_s27 + $0x10] sm:$0xff]  ;;  %p1293_p8 = pnand %p1292_p1, %p1494_p13  ;;  %s1297_s8 = scalar_lea.vmem %s1296_s25, 16384 }
  0x44   : > { %1005 = vmatpush3.msra.mxu0 %v318_v2  ;;  %1146 = vmatpush3.msra.mxu1 %v318_v2  ;;  %v241_v16 = vld [vmem:[%s1531_s27] sm:$0xff]  ;;  %v242_v18 = vld [vmem:[%s1531_s27 + $0x8] sm:$0xff]  ;;  %v275_v21 = vld [vmem:[%s1531_s27 + $0x110] sm:$0xff]  ;;  %p1298_p0 = scmp.lt.s32.totalorder %s1743_s29, %s1296_s25  ;;  %p1299_p2 = scmp.lt.s32.totalorder %s1297_s8, %s1291_s10 }
  0x45   : > { %1006 = vmatprep.subr.mxu0 %v317_v3  ;;  %1131 = vmatprep.subr.mxu1 %v317_v3  ;;  %v273_v17 = vld [vmem:[%s1531_s27 + $0x100] sm:$0xff]  ;;  %v274_v19 = vld [vmem:[%s1531_s27 + $0x108] sm:$0xff]  ;;  %v244_v22 = vld [vmem:[%s1531_s27 + $0x18] sm:$0xff]  ;;  %p1294_p12 = pneg %p1293_p8 }
  0x46   : > { %1007 = vmatpush3.msra.mxu0 %v317_v3  ;;  %1147 = vmatpush3.msra.mxu1 %v317_v3  ;;  %v276_v23 = vld [vmem:[%s1531_s27 + $0x118] sm:$0xff]  ;;  %v245_v24 = vld [vmem:[%s1531_s27 + $0x20] sm:$0xff]  ;;  %v246_v26 = vld [vmem:[%s1531_s27 + $0x28] sm:$0xff]  ;;  %p1300_p3 = por %p1299_p2, %p1298_p0 }
  0x47   : > { %1008 = vmatprep.subr.mxu0 %v316_v4  ;;  %1132 = vmatprep.subr.mxu1 %v316_v4  ;;  %v277_v25 = vld [vmem:[%s1531_s27 + $0x120] sm:$0xff]  ;;  %v278_v27 = vld [vmem:[%s1531_s27 + $0x128] sm:$0xff]  ;;  %v247_v28 = vld [vmem:[%s1531_s27 + $0x30] sm:$0xff] }
  0x48   : > { %1009 = vmatpush3.msra.mxu0 %v316_v4  ;;  %1148 = vmatpush3.msra.mxu1 %v316_v4  ;;  %v279_v29 = vld [vmem:[%s1531_s27 + $0x130] sm:$0xff]  ;;  %v248_v30 = vld [vmem:[%s1531_s27 + $0x38] sm:$0xff]  ;;  %v249_v32 = vld [vmem:[%s1531_s27 + $0x40] sm:$0xff]  ;;  %p1301_p5 = pnand %p1300_p3, %p1294_p12 }
  0x49   : > { %1010 = vmatprep.subr.mxu0 %v315_v5  ;;  %1133 = vmatprep.subr.mxu1 %v315_v5  ;;  %v280_v31 = vld [vmem:[%s1531_s27 + $0x138] sm:$0xff]  ;;  %v281_v33 = vld [vmem:[%s1531_s27 + $0x140] sm:$0xff]  ;;  %v250_v34 = vld [vmem:[%s1531_s27 + $0x48] sm:$0xff] }
  0x4a   : > { %1011 = vmatpush3.msra.mxu0 %v315_v5  ;;  %1149 = vmatpush3.msra.mxu1 %v315_v5  ;;  %v282_v35 = vld [vmem:[%s1531_s27 + $0x148] sm:$0xff]  ;;  %v251_v36 = vld [vmem:[%s1531_s27 + $0x50] sm:$0xff]  ;;  %v252_v38 = vld [vmem:[%s1531_s27 + $0x58] sm:$0xff] }
  0x4b   : > { %1012 = vmatprep.subr.mxu0 %v314_v6  ;;  %1134 = vmatprep.subr.mxu1 %v314_v6  ;;  %v283_v37 = vld [vmem:[%s1531_s27 + $0x150] sm:$0xff]  ;;  %v284_v39 = vld [vmem:[%s1531_s27 + $0x158] sm:$0xff]  ;;  %v253_v40 = vld [vmem:[%s1531_s27 + $0x60] sm:$0xff] }
  0x4c   : > { %1013 = vmatpush3.msra.mxu0 %v314_v6  ;;  %1150 = vmatpush3.msra.mxu1 %v314_v6  ;;  %v285_v41 = vld [vmem:[%s1531_s27 + $0x160] sm:$0xff]  ;;  %v254_v42 = vld [vmem:[%s1531_s27 + $0x68] sm:$0xff]  ;;  %v255_v44 = vld [vmem:[%s1531_s27 + $0x70] sm:$0xff] }
  0x4d   : > { %1014 = vmatprep.subr.mxu0 %v313_v7  ;;  %1135 = vmatprep.subr.mxu1 %v313_v7  ;;  %v286_v43 = vld [vmem:[%s1531_s27 + $0x168] sm:$0xff]  ;;  %v287_v45 = vld [vmem:[%s1531_s27 + $0x170] sm:$0xff]  ;;  %v256_v46 = vld [vmem:[%s1531_s27 + $0x78] sm:$0xff] }
  0x4e   : > { %1015 = vmatpush3.msra.mxu0 %v313_v7  ;;  %1151 = vmatpush3.msra.mxu1 %v313_v7  ;;  %v288_v47 = vld [vmem:[%s1531_s27 + $0x178] sm:$0xff]  ;;  %v257_v48 = vld [vmem:[%s1531_s27 + $0x80] sm:$0xff]  ;;  %v258_v50 = vld [vmem:[%s1531_s27 + $0x88] sm:$0xff] }
  0x4f   : > { %1016 = vmatprep.subr.mxu0 %v312_v8  ;;  %1136 = vmatprep.subr.mxu1 %v312_v8  ;;  %v289_v49 = vld [vmem:[%s1531_s27 + $0x180] sm:$0xff]  ;;  %v290_v51 = vld [vmem:[%s1531_s27 + $0x188] sm:$0xff]  ;;  %v259_v52 = vld [vmem:[%s1531_s27 + $0x90] sm:$0xff] }
  0x50   : > { %1017 = vmatpush3.msra.mxu0 %v312_v8  ;;  %1152 = vmatpush3.msra.mxu1 %v312_v8  ;;  %v291_v53 = vld [vmem:[%s1531_s27 + $0x190] sm:$0xff]  ;;  %v260_v54 = vld [vmem:[%s1531_s27 + $0x98] sm:$0xff]  ;;  %v261_v56 = vld [vmem:[%s1531_s27 + $0xa0] sm:$0xff] }
  0x51   : > { %1018 = vmatprep.subr.mxu0 %v311_v9  ;;  %1137 = vmatprep.subr.mxu1 %v311_v9  ;;  %v292_v55 = vld [vmem:[%s1531_s27 + $0x198] sm:$0xff]  ;;  %v293_v57 = vld [vmem:[%s1531_s27 + $0x1a0] sm:$0xff]  ;;  %v262_v58 = vld [vmem:[%s1531_s27 + $0xa8] sm:$0xff] }
  0x52   : > { %1019 = vmatpush3.msra.mxu0 %v311_v9  ;;  %1153 = vmatpush3.msra.mxu1 %v311_v9  ;;  %v294_v59 = vld [vmem:[%s1531_s27 + $0x1a8] sm:$0xff]  ;;  %v263_v60 = vld [vmem:[%s1531_s27 + $0xb0] sm:$0xff]  ;;  %v264_v62 = vld [vmem:[%s1531_s27 + $0xb8] sm:$0xff] }
  0x53   : > { %1020 = vmatprep.subr.mxu0 %v310_v10  ;;  %1138 = vmatprep.subr.mxu1 %v310_v10  ;;  %v295_v61 = vld [vmem:[%s1531_s27 + $0x1b0] sm:$0xff]  ;;  %v296_v63 = vld [vmem:[%s1531_s27 + $0x1b8] sm:$0xff]  ;;  %v265_v0 = vld [vmem:[%s1531_s27 + $0xc0] sm:$0xff] }
  0x54   : > { %1021 = vmatpush3.msra.mxu0 %v310_v10  ;;  %1154 = vmatpush3.msra.mxu1 %v310_v10  ;;  %v297_v1 = vld [vmem:[%s1531_s27 + $0x1c0] sm:$0xff]  ;;  %v266_v2 = vld [vmem:[%s1531_s27 + $0xc8] sm:$0xff]  ;;  %v267_v4 = vld [vmem:[%s1531_s27 + $0xd0] sm:$0xff] }
  0x55   : > { %1022 = vmatprep.subr.mxu0 %v309_v11  ;;  %1139 = vmatprep.subr.mxu1 %v309_v11  ;;  %v298_v3 = vld [vmem:[%s1531_s27 + $0x1c8] sm:$0xff]  ;;  %v299_v5 = vld [vmem:[%s1531_s27 + $0x1d0] sm:$0xff]  ;;  %v268_v6 = vld [vmem:[%s1531_s27 + $0xd8] sm:$0xff] }
  0x56   : > { %1023 = vmatpush3.msra.mxu0 %v309_v11  ;;  %1155 = vmatpush3.msra.mxu1 %v309_v11  ;;  %v300_v7 = vld [vmem:[%s1531_s27 + $0x1d8] sm:$0xff]  ;;  %v269_v8 = vld [vmem:[%s1531_s27 + $0xe0] sm:$0xff]  ;;  %v270_v10 = vld [vmem:[%s1531_s27 + $0xe8] sm:$0xff] }
  0x57   : > { %1024 = vmatprep.subr.mxu0 %v308_v12  ;;  %1140 = vmatprep.subr.mxu1 %v308_v12  ;;  %v301_v9 = vld [vmem:[%s1531_s27 + $0x1e0] sm:$0xff]  ;;  %v302_v11 = vld [vmem:[%s1531_s27 + $0x1e8] sm:$0xff] }
  0x58   : > { %1025 = vmatpush3.msra.mxu0 %v308_v12  ;;  %1156 = vmatpush3.msra.mxu1 %v308_v12  ;;  %v271_v12 = vld [vmem:[%s1531_s27 + $0xf0] sm:$0xff] }
  0x59   : > { %1026 = vmatprep.subr.mxu0 %v307_v13  ;;  %1141 = vmatprep.subr.mxu1 %v307_v13 }
  0x5a   : > { %1027 = vmatpush3.msra.mxu0 %v307_v13  ;;  %1157 = vmatpush3.msra.mxu1 %v307_v13  ;;  %v303_v13 = vld [vmem:[%s1531_s27 + $0x1f0] sm:$0xff] }
  0x5b   : > { %1028 = vmatprep.subr.mxu0 %v306_v14  ;;  %1142 = vmatprep.subr.mxu1 %v306_v14 }
  0x5c   : > { %1029 = vmatpush3.msra.mxu0 %v306_v14  ;;  %1158 = vmatpush3.msra.mxu1 %v306_v14  ;;  %v272_v14 = vld [vmem:[%s1531_s27 + $0xf8] sm:$0xff] }
  0x5d   : > { %1030 = vmatprep.subr.mxu0 %v305_v15  ;;  %1143 = vmatprep.subr.mxu1 %v305_v15 }
  0x5e   : > { %1031 = vmatpush3.msra.mxu0 %v305_v15  ;;  %1159 = vmatpush3.msra.mxu1 %v305_v15  ;;  %v304_v15 = vld [vmem:[%s1531_s27 + $0x1f8] sm:$0xff] }
  0x5f   : > { %1032 = vmatprep.mubr.f32.mxu0 %v241_v16  ;;  %1080 = vmatprep.mubr.f32.mxu1 %v273_v17  ;;  %v1608_v16 = vld [vmem:[%s1799_s2] ss:$0 sm:$0xff] }
  0x60   : > { %1033 = vmatmul.mubr.f32.vlgmr.msra.gmra.mxu0 %v242_v18  ;;  %1081 = vmatmul.mubr.f32.vlgmr.msra.gmra.mxu1 %v274_v19 }
  0x61   : > { %1035 = vmatprep.mubr.f32.mxu0 %v243_v20  ;;  %1083 = vmatprep.mubr.f32.mxu1 %v275_v21 }
  0x64   : > { %1036 = vmatmul.mubr.f32.gmra.mxu0 %v244_v22  ;;  %1084 = vmatmul.mubr.f32.gmra.mxu1 %v276_v23 }
  0x65   : > { %1038 = vmatprep.mubr.f32.mxu0 %v245_v24  ;;  %1086 = vmatprep.mubr.f32.mxu1 %v277_v25 }
  0x68   : > { %1039 = vmatmul.mubr.f32.gmra.mxu0 %v246_v26  ;;  %1087 = vmatmul.mubr.f32.gmra.mxu1 %v278_v27 }
  0x69   : > { %1041 = vmatprep.mubr.f32.mxu0 %v247_v28  ;;  %1089 = vmatprep.mubr.f32.mxu1 %v279_v29 }
  0x6c   : > { %1042 = vmatmul.mubr.f32.gmra.mxu0 %v248_v30  ;;  %1090 = vmatmul.mubr.f32.gmra.mxu1 %v280_v31 }
  0x6d   : > { %1044 = vmatprep.mubr.f32.mxu0 %v249_v32  ;;  %1092 = vmatprep.mubr.f32.mxu1 %v281_v33 }
  0x70   : > { %1045 = vmatmul.mubr.f32.gmra.mxu0 %v250_v34  ;;  %1093 = vmatmul.mubr.f32.gmra.mxu1 %v282_v35 }
  0x71   : > { %1047 = vmatprep.mubr.f32.mxu0 %v251_v36  ;;  %1095 = vmatprep.mubr.f32.mxu1 %v283_v37 }
  0x74   : > { %1048 = vmatmul.mubr.f32.gmra.mxu0 %v252_v38  ;;  %1096 = vmatmul.mubr.f32.gmra.mxu1 %v284_v39 }
  0x75   : > { %1050 = vmatprep.mubr.f32.mxu0 %v253_v40  ;;  %1098 = vmatprep.mubr.f32.mxu1 %v285_v41 }
  0x78   : > { %1051 = vmatmul.mubr.f32.gmra.mxu0 %v254_v42  ;;  %1099 = vmatmul.mubr.f32.gmra.mxu1 %v286_v43 }
  0x79   : > { %1053 = vmatprep.mubr.f32.mxu0 %v255_v44  ;;  %1101 = vmatprep.mubr.f32.mxu1 %v287_v45 }
  0x7c   : > { %1054 = vmatmul.mubr.f32.gmra.mxu0 %v256_v46  ;;  %1102 = vmatmul.mubr.f32.gmra.mxu1 %v288_v47 }
  0x7d   : > { %1056 = vmatprep.mubr.f32.mxu0 %v257_v48  ;;  %1104 = vmatprep.mubr.f32.mxu1 %v289_v49 }
  0x80   : > { %1057 = vmatmul.mubr.f32.gmra.mxu0 %v258_v50  ;;  %1105 = vmatmul.mubr.f32.gmra.mxu1 %v290_v51 }
  0x81   : > { %1059 = vmatprep.mubr.f32.mxu0 %v259_v52  ;;  %1107 = vmatprep.mubr.f32.mxu1 %v291_v53 }
  0x84   : > { %1060 = vmatmul.mubr.f32.gmra.mxu0 %v260_v54  ;;  %1108 = vmatmul.mubr.f32.gmra.mxu1 %v292_v55 }
  0x85   : > { %1062 = vmatprep.mubr.f32.mxu0 %v261_v56  ;;  %1110 = vmatprep.mubr.f32.mxu1 %v293_v57 }
  0x88   : > { %1063 = vmatmul.mubr.f32.gmra.mxu0 %v262_v58  ;;  %1111 = vmatmul.mubr.f32.gmra.mxu1 %v294_v59 }
  0x89   : > { %1065 = vmatprep.mubr.f32.mxu0 %v263_v60  ;;  %1113 = vmatprep.mubr.f32.mxu1 %v295_v61 }
  0x8c   : > { %1066 = vmatmul.mubr.f32.gmra.mxu0 %v264_v62  ;;  %1114 = vmatmul.mubr.f32.gmra.mxu1 %v296_v63 }
  0x8d   : > { %1068 = vmatprep.mubr.f32.mxu0 %v265_v0  ;;  %1116 = vmatprep.mubr.f32.mxu1 %v297_v1 }
  0x90   : > { %1069 = vmatmul.mubr.f32.gmra.mxu0 %v266_v2  ;;  %1117 = vmatmul.mubr.f32.gmra.mxu1 %v298_v3 }
  0x91   : > { %1071 = vmatprep.mubr.f32.mxu0 %v267_v4  ;;  %1119 = vmatprep.mubr.f32.mxu1 %v299_v5 }
  0x94   : > { %1072 = vmatmul.mubr.f32.gmra.mxu0 %v268_v6  ;;  %1120 = vmatmul.mubr.f32.gmra.mxu1 %v300_v7 }
  0x95   : > { %1074 = vmatprep.mubr.f32.mxu0 %v269_v8  ;;  %1122 = vmatprep.mubr.f32.mxu1 %v301_v9 }
  0x98   : > { %1075 = vmatmul.mubr.f32.gmra.mxu0 %v270_v10  ;;  %1123 = vmatmul.mubr.f32.gmra.mxu1 %v302_v11 }
  0x99   : > { %1077 = vmatprep.mubr.f32.mxu0 %v271_v12  ;;  %1125 = vmatprep.mubr.f32.mxu1 %v303_v13 }
  0x9c   : > { %1078 = vmatmul.mubr.f32.gmra.mxu0 %v272_v14  ;;  %1126 = vmatmul.mubr.f32.gmra.mxu1 %v304_v15 }
 0x120   : > { %v1034_v17 = vpop.f32.mrf.mxu0  ;;  %v1082_v18 = vpop.f32.mrf.mxu1 }
 0x121   : > { %v400_v19 = vadd.f32 %v1034_v17, %v1608_v16  ;;  %v560_v20 = vadd.f32 %v1082_v18, %v1608_v16 }
 0x122   : > { %v394_v21 = vpop.f32.mrf.mxu0  ;;  %v554_v22 = vpop.f32.mrf.mxu1 }
 0x123   : > { %714 = vst [vmem:[%s1614_s24 + $0x8] sm:$0xff] %v400_v19  ;;  %746 = vst [vmem:[%s1614_s24 + $0x108] sm:$0xff] %v560_v20  ;;  %v395_v23 = vadd.f32 %v1608_v16, %v394_v21  ;;  %v555_v24 = vadd.f32 %v1608_v16, %v554_v22 }
 0x124   : > { %v1037_v25 = vpop.f32.mrf.mxu0  ;;  %v1085_v26 = vpop.f32.mrf.mxu1 }
 0x125   : > { %713 = vst [vmem:[%s1614_s24] sm:$0xff] %v395_v23  ;;  %745 = vst [vmem:[%s1614_s24 + $0x100] sm:$0xff] %v555_v24  ;;  %v410_v27 = vadd.f32 %v1037_v25, %v1608_v16  ;;  %v570_v28 = vadd.f32 %v1085_v26, %v1608_v16 }
 0x126   : > { %v404_v29 = vpop.f32.mrf.mxu0  ;;  %v564_v30 = vpop.f32.mrf.mxu1 }
 0x127   : > { %716 = vst [vmem:[%s1614_s24 + $0x18] sm:$0xff] %v410_v27  ;;  %748 = vst [vmem:[%s1614_s24 + $0x118] sm:$0xff] %v570_v28  ;;  %v405_v31 = vadd.f32 %v1608_v16, %v404_v29  ;;  %v565_v32 = vadd.f32 %v1608_v16, %v564_v30 }
 0x128   : > { %v1040_v33 = vpop.f32.mrf.mxu0  ;;  %v1088_v34 = vpop.f32.mrf.mxu1 }
 0x129   : > { %715 = vst [vmem:[%s1614_s24 + $0x10] sm:$0xff] %v405_v31  ;;  %747 = vst [vmem:[%s1614_s24 + $0x110] sm:$0xff] %v565_v32  ;;  %v420_v35 = vadd.f32 %v1040_v33, %v1608_v16  ;;  %v580_v36 = vadd.f32 %v1088_v34, %v1608_v16 }
 0x12a   : > { %v414_v37 = vpop.f32.mrf.mxu0  ;;  %v574_v38 = vpop.f32.mrf.mxu1 }
 0x12b   : > { %718 = vst [vmem:[%s1614_s24 + $0x28] sm:$0xff] %v420_v35  ;;  %750 = vst [vmem:[%s1614_s24 + $0x128] sm:$0xff] %v580_v36  ;;  %v415_v39 = vadd.f32 %v1608_v16, %v414_v37  ;;  %v575_v40 = vadd.f32 %v1608_v16, %v574_v38 }
 0x12c   : > { %v1043_v41 = vpop.f32.mrf.mxu0  ;;  %v1091_v42 = vpop.f32.mrf.mxu1 }
 0x12d   : > { %717 = vst [vmem:[%s1614_s24 + $0x20] sm:$0xff] %v415_v39  ;;  %749 = vst [vmem:[%s1614_s24 + $0x120] sm:$0xff] %v575_v40  ;;  %v430_v43 = vadd.f32 %v1043_v41, %v1608_v16  ;;  %v590_v44 = vadd.f32 %v1091_v42, %v1608_v16 }
 0x12e   : > { %v424_v45 = vpop.f32.mrf.mxu0  ;;  %v584_v46 = vpop.f32.mrf.mxu1 }
 0x12f   : > { %720 = vst [vmem:[%s1614_s24 + $0x38] sm:$0xff] %v430_v43  ;;  %752 = vst [vmem:[%s1614_s24 + $0x138] sm:$0xff] %v590_v44  ;;  %v425_v47 = vadd.f32 %v1608_v16, %v424_v45  ;;  %v585_v48 = vadd.f32 %v1608_v16, %v584_v46 }
 0x130   : > { %v1046_v49 = vpop.f32.mrf.mxu0  ;;  %v1094_v50 = vpop.f32.mrf.mxu1 }
 0x131   : > { %719 = vst [vmem:[%s1614_s24 + $0x30] sm:$0xff] %v425_v47  ;;  %751 = vst [vmem:[%s1614_s24 + $0x130] sm:$0xff] %v585_v48  ;;  %v440_v51 = vadd.f32 %v1046_v49, %v1608_v16  ;;  %v600_v52 = vadd.f32 %v1094_v50, %v1608_v16 }
 0x132   : > { %v434_v53 = vpop.f32.mrf.mxu0  ;;  %v594_v54 = vpop.f32.mrf.mxu1 }
 0x133   : > { %722 = vst [vmem:[%s1614_s24 + $0x48] sm:$0xff] %v440_v51  ;;  %754 = vst [vmem:[%s1614_s24 + $0x148] sm:$0xff] %v600_v52  ;;  %v435_v55 = vadd.f32 %v1608_v16, %v434_v53  ;;  %v595_v56 = vadd.f32 %v1608_v16, %v594_v54 }
 0x134   : > { %v1049_v57 = vpop.f32.mrf.mxu0  ;;  %v1097_v58 = vpop.f32.mrf.mxu1 }
 0x135   : > { %721 = vst [vmem:[%s1614_s24 + $0x40] sm:$0xff] %v435_v55  ;;  %753 = vst [vmem:[%s1614_s24 + $0x140] sm:$0xff] %v595_v56  ;;  %v450_v59 = vadd.f32 %v1049_v57, %v1608_v16  ;;  %v610_v60 = vadd.f32 %v1097_v58, %v1608_v16 }
 0x136   : > { %v444_v61 = vpop.f32.mrf.mxu0  ;;  %v604_v62 = vpop.f32.mrf.mxu1 }
 0x137   : > { %724 = vst [vmem:[%s1614_s24 + $0x58] sm:$0xff] %v450_v59  ;;  %756 = vst [vmem:[%s1614_s24 + $0x158] sm:$0xff] %v610_v60  ;;  %v445_v63 = vadd.f32 %v1608_v16, %v444_v61  ;;  %v605_v0 = vadd.f32 %v1608_v16, %v604_v62 }
 0x138   : > { %v1052_v1 = vpop.f32.mrf.mxu0  ;;  %v1100_v2 = vpop.f32.mrf.mxu1 }
 0x139   : > { %723 = vst [vmem:[%s1614_s24 + $0x50] sm:$0xff] %v445_v63  ;;  %755 = vst [vmem:[%s1614_s24 + $0x150] sm:$0xff] %v605_v0  ;;  %v460_v3 = vadd.f32 %v1052_v1, %v1608_v16  ;;  %v620_v4 = vadd.f32 %v1100_v2, %v1608_v16 }
 0x13a   : > { %v454_v5 = vpop.f32.mrf.mxu0  ;;  %v614_v6 = vpop.f32.mrf.mxu1 }
 0x13b   : > { %726 = vst [vmem:[%s1614_s24 + $0x68] sm:$0xff] %v460_v3  ;;  %758 = vst [vmem:[%s1614_s24 + $0x168] sm:$0xff] %v620_v4  ;;  %v455_v7 = vadd.f32 %v1608_v16, %v454_v5  ;;  %v615_v8 = vadd.f32 %v1608_v16, %v614_v6 }
 0x13c   : > { %v1055_v9 = vpop.f32.mrf.mxu0  ;;  %v1103_v10 = vpop.f32.mrf.mxu1 }
 0x13d   : > { %725 = vst [vmem:[%s1614_s24 + $0x60] sm:$0xff] %v455_v7  ;;  %757 = vst [vmem:[%s1614_s24 + $0x160] sm:$0xff] %v615_v8  ;;  %v470_v11 = vadd.f32 %v1055_v9, %v1608_v16  ;;  %v630_v12 = vadd.f32 %v1103_v10, %v1608_v16 }
 0x13e   : > { %v464_v13 = vpop.f32.mrf.mxu0  ;;  %v624_v14 = vpop.f32.mrf.mxu1 }
 0x13f   : > { %728 = vst [vmem:[%s1614_s24 + $0x78] sm:$0xff] %v470_v11  ;;  %760 = vst [vmem:[%s1614_s24 + $0x178] sm:$0xff] %v630_v12  ;;  %v465_v15 = vadd.f32 %v1608_v16, %v464_v13  ;;  %v625_v17 = vadd.f32 %v1608_v16, %v624_v14 }
 0x140   : > { %v1058_v18 = vpop.f32.mrf.mxu0  ;;  %v1106_v19 = vpop.f32.mrf.mxu1 }
 0x141   : > { %727 = vst [vmem:[%s1614_s24 + $0x70] sm:$0xff] %v465_v15  ;;  %759 = vst [vmem:[%s1614_s24 + $0x170] sm:$0xff] %v625_v17  ;;  %v480_v20 = vadd.f32 %v1058_v18, %v1608_v16  ;;  %v640_v21 = vadd.f32 %v1106_v19, %v1608_v16 }
 0x142   : > { %v474_v22 = vpop.f32.mrf.mxu0  ;;  %v634_v23 = vpop.f32.mrf.mxu1 }
 0x143   : > { %730 = vst [vmem:[%s1614_s24 + $0x88] sm:$0xff] %v480_v20  ;;  %762 = vst [vmem:[%s1614_s24 + $0x188] sm:$0xff] %v640_v21  ;;  %v475_v24 = vadd.f32 %v1608_v16, %v474_v22  ;;  %v635_v25 = vadd.f32 %v1608_v16, %v634_v23 }
 0x144   : > { %v1061_v26 = vpop.f32.mrf.mxu0  ;;  %v1109_v27 = vpop.f32.mrf.mxu1 }
 0x145   : > { %729 = vst [vmem:[%s1614_s24 + $0x80] sm:$0xff] %v475_v24  ;;  %761 = vst [vmem:[%s1614_s24 + $0x180] sm:$0xff] %v635_v25  ;;  %v490_v28 = vadd.f32 %v1061_v26, %v1608_v16  ;;  %v650_v29 = vadd.f32 %v1109_v27, %v1608_v16 }
 0x146   : > { %v484_v30 = vpop.f32.mrf.mxu0  ;;  %v644_v31 = vpop.f32.mrf.mxu1 }
 0x147   : > { %732 = vst [vmem:[%s1614_s24 + $0x98] sm:$0xff] %v490_v28  ;;  %764 = vst [vmem:[%s1614_s24 + $0x198] sm:$0xff] %v650_v29  ;;  %v485_v32 = vadd.f32 %v1608_v16, %v484_v30  ;;  %v645_v33 = vadd.f32 %v1608_v16, %v644_v31 }
 0x148   : > { %v1064_v34 = vpop.f32.mrf.mxu0  ;;  %v1112_v35 = vpop.f32.mrf.mxu1 }
 0x149   : > { %731 = vst [vmem:[%s1614_s24 + $0x90] sm:$0xff] %v485_v32  ;;  %763 = vst [vmem:[%s1614_s24 + $0x190] sm:$0xff] %v645_v33  ;;  %v500_v36 = vadd.f32 %v1064_v34, %v1608_v16  ;;  %v660_v37 = vadd.f32 %v1112_v35, %v1608_v16 }
 0x14a   : > { %v494_v38 = vpop.f32.mrf.mxu0  ;;  %v654_v39 = vpop.f32.mrf.mxu1 }
 0x14b   : > { %734 = vst [vmem:[%s1614_s24 + $0xa8] sm:$0xff] %v500_v36  ;;  %766 = vst [vmem:[%s1614_s24 + $0x1a8] sm:$0xff] %v660_v37  ;;  %v495_v40 = vadd.f32 %v1608_v16, %v494_v38  ;;  %v655_v41 = vadd.f32 %v1608_v16, %v654_v39 }
 0x14c   : > { %v1067_v42 = vpop.f32.mrf.mxu0  ;;  %v1115_v43 = vpop.f32.mrf.mxu1 }
 0x14d   : > { %733 = vst [vmem:[%s1614_s24 + $0xa0] sm:$0xff] %v495_v40  ;;  %765 = vst [vmem:[%s1614_s24 + $0x1a0] sm:$0xff] %v655_v41  ;;  %v510_v44 = vadd.f32 %v1067_v42, %v1608_v16  ;;  %v670_v45 = vadd.f32 %v1115_v43, %v1608_v16 }
 0x14e   : > { %v504_v46 = vpop.f32.mrf.mxu0  ;;  %v664_v47 = vpop.f32.mrf.mxu1 }
 0x14f   : > { %736 = vst [vmem:[%s1614_s24 + $0xb8] sm:$0xff] %v510_v44  ;;  %768 = vst [vmem:[%s1614_s24 + $0x1b8] sm:$0xff] %v670_v45  ;;  %v505_v48 = vadd.f32 %v1608_v16, %v504_v46  ;;  %v665_v49 = vadd.f32 %v1608_v16, %v664_v47 }
 0x150   : > { %v1070_v50 = vpop.f32.mrf.mxu0  ;;  %v1118_v51 = vpop.f32.mrf.mxu1 }
 0x151   : > { %735 = vst [vmem:[%s1614_s24 + $0xb0] sm:$0xff] %v505_v48  ;;  %767 = vst [vmem:[%s1614_s24 + $0x1b0] sm:$0xff] %v665_v49  ;;  %v520_v52 = vadd.f32 %v1070_v50, %v1608_v16  ;;  %v680_v53 = vadd.f32 %v1118_v51, %v1608_v16 }
 0x152   : > { %v514_v54 = vpop.f32.mrf.mxu0  ;;  %v674_v55 = vpop.f32.mrf.mxu1 }
 0x153   : > { %738 = vst [vmem:[%s1614_s24 + $0xc8] sm:$0xff] %v520_v52  ;;  %770 = vst [vmem:[%s1614_s24 + $0x1c8] sm:$0xff] %v680_v53  ;;  %v515_v56 = vadd.f32 %v1608_v16, %v514_v54  ;;  %v675_v57 = vadd.f32 %v1608_v16, %v674_v55 }
 0x154   : > { %v1073_v58 = vpop.f32.mrf.mxu0  ;;  %v1121_v59 = vpop.f32.mrf.mxu1 }
 0x155   : > { %737 = vst [vmem:[%s1614_s24 + $0xc0] sm:$0xff] %v515_v56  ;;  %769 = vst [vmem:[%s1614_s24 + $0x1c0] sm:$0xff] %v675_v57  ;;  %v530_v60 = vadd.f32 %v1073_v58, %v1608_v16  ;;  %v690_v61 = vadd.f32 %v1121_v59, %v1608_v16 }
 0x156   : > { %v524_v62 = vpop.f32.mrf.mxu0  ;;  %v684_v63 = vpop.f32.mrf.mxu1 }
 0x157   : > { %740 = vst [vmem:[%s1614_s24 + $0xd8] sm:$0xff] %v530_v60  ;;  %772 = vst [vmem:[%s1614_s24 + $0x1d8] sm:$0xff] %v690_v61  ;;  %v525_v0 = vadd.f32 %v1608_v16, %v524_v62  ;;  %v685_v1 = vadd.f32 %v1608_v16, %v684_v63 }
 0x158   : > { %v1076_v2 = vpop.f32.mrf.mxu0  ;;  %v1124_v3 = vpop.f32.mrf.mxu1 }
 0x159   : > { %739 = vst [vmem:[%s1614_s24 + $0xd0] sm:$0xff] %v525_v0  ;;  %771 = vst [vmem:[%s1614_s24 + $0x1d0] sm:$0xff] %v685_v1  ;;  %v540_v4 = vadd.f32 %v1076_v2, %v1608_v16  ;;  %v700_v5 = vadd.f32 %v1124_v3, %v1608_v16 }
 0x15a   : > { %v534_v6 = vpop.f32.mrf.mxu0  ;;  %v694_v7 = vpop.f32.mrf.mxu1 }
 0x15b   : > { %742 = vst [vmem:[%s1614_s24 + $0xe8] sm:$0xff] %v540_v4  ;;  %774 = vst [vmem:[%s1614_s24 + $0x1e8] sm:$0xff] %v700_v5  ;;  %v535_v8 = vadd.f32 %v1608_v16, %v534_v6  ;;  %v695_v9 = vadd.f32 %v1608_v16, %v694_v7 }
 0x15c   : > { %v1079_v10 = vpop.f32.mrf.mxu0  ;;  %v1127_v11 = vpop.f32.mrf.mxu1 }
 0x15d   : > { %741 = vst [vmem:[%s1614_s24 + $0xe0] sm:$0xff] %v535_v8  ;;  %773 = vst [vmem:[%s1614_s24 + $0x1e0] sm:$0xff] %v695_v9  ;;  %v550_v12 = vadd.f32 %v1079_v10, %v1608_v16  ;;  %v710_v13 = vadd.f32 %v1127_v11, %v1608_v16 }
 0x15e   : > { %v544_v14 = vpop.f32.mrf.mxu0  ;;  %v704_v15 = vpop.f32.mrf.mxu1 }
 0x15f   : > { %744 = vst [vmem:[%s1614_s24 + $0xf8] sm:$0xff] %v550_v12  ;;  %776 = vst [vmem:[%s1614_s24 + $0x1f8] sm:$0xff] %v710_v13  ;;  %v545_v17 = vadd.f32 %v1608_v16, %v544_v14  ;;  %v705_v18 = vadd.f32 %v1608_v16, %v704_v15 }
 0x161   : > { %743 = vst [vmem:[%s1614_s24 + $0xf0] sm:$0xff] %v545_v17  ;;  %775 = vst [vmem:[%s1614_s24 + $0x1f0] sm:$0xff] %v705_v18 }
 0x162   : > { %1304 = shalt.err (!%p1301_p5)
}
 0x163   : > { %s1305_s18 = scalar_lea.hbm %s1741_s21, 8192  ;;  %s1309_s27 = scalar_lea.hbm %s1800_s3, 16384 }
 0x164   : > { %p1306_p7 = scmp.ne.s32.totalorder %s1741_s21, %s1305_s18  ;;  %p1310_p9 = scmp.lt.s32.totalorder %s1741_s21, %s1800_s3 }
 0x165   : > { %p1311_p11 = scmp.lt.s32.totalorder %s1309_s27, %s1305_s18 }
 0x166   : > { %p1307_p4 = pnand %p1306_p7, %p1494_p13 }
 0x167   : > { %p1312_p10 = por %p1311_p11, %p1310_p9 }
 0x168   : > { %p1308_p6 = pneg %p1307_p4 }
 0x16a   : > { %p1313_p1 = pnand %p1312_p10, %p1308_p6 }
 0x16c   : > { %1316 = shalt.err (!%p1313_p1)
}
 0x16d   : > { %s1382_s24 = smov 128   ;;  %s1383_s30 = smov 8  }
 0x16e   : > { %1166 = dma.vmem_to_hbm [thread:$0]  (%p1494_p13), %s1743_s29, 8192, %s1741_s21, %s778_s15, %s1382_s24, %s1382_s24, %s1383_s30  }
 0x16f PF: > { %s807_s5 = sand.u32 1, %s1355_s12   ;;  %p1816_p8 = scmp.ne.s32.totalorder %s1807_s23, 0 }
 0x170   : > { %p1817_p12 = scmp.ge.s32.totalorder %s1375_s17, 2  ;;  %s808_s6 = scalar_lea.sflag [#allocation4], %s807_s5 }
 0x172   : > { %p1177_p0 = pnand %p1817_p12, %p1816_p8 }
 0x174   : > { %p1178_p2 = pneg %p1177_p0 }
 0x176   : > { %1350 = dma.done.wait (%p1178_p2), %s808_s6, 8192  }
 0x177   : > { %1352 = vsyncadd (%p1178_p2), %s808_s6, 4294959104  ;;  %s20_s17 = sadd.s32 1, %s1375_s17   ;;  %s1818_s12 = smov %s1359_s13 }
 0x178   : > { %p17_p3 = scmp.ge.s32.totalorder %s20_s17, 4   ;;  %s1819_s13 = smov %s1363_s14 }
 0x179   : > { %s1820_s14 = smov %s1503_s19  ;;  %s1821_s15 = smov %s1371_s16 }
 0x17a   : > { %s1822_s16 = smov %s1824_s28  ;;  %19 = sbr.rel (!%p17_p3) target bundleno = 7 (0x7), region = 85 }
 0x17f   :  { %813 = vsyncpa [#allocation3], 1 }
 0x180   :  { %815 = vsyncpa [#allocation3 + $0x1], 1 }
 0x181   :  { %816 = vsyncpa [#allocation6], 1 }
 0x182   :  { %817 = vsyncpa [#allocation4], 1 }
 0x183   :  { %819 = vsyncpa [#allocation4 + $0x1], 1 }

</bundles_post_ra>
